<compile_context>
chip_gen: v7x
topology: tpu7x:2x2x1
jax: 0.10.0
libtpu: 0.0.40
codegen_flags: <defaults>
</compile_context>

<pallas_src>
import math

import jax
import jax.numpy as jnp
import numpy as np
from jax.experimental import pallas as pl
from jax.experimental.pallas import tpu as pltpu

_SQRT_2PI = math.sqrt(2.0 * math.pi)
_MAX_SPATIAL_TILE = 2048


def _pick_spatial_tile(s):
    """Largest multiple of 128 that divides S and is <= _MAX_SPATIAL_TILE (else full S)."""
    if s % 128 != 0:
        return s                      # small / odd spatial extents: one full-extent block
    t = min(_MAX_SPATIAL_TILE, s)
    t -= t % 128
    while s % t != 0:
        t -= 128
    return t


# ------------------------------ pass 1: global statistics ------------------------------

def _gfrm_stats_kernel(b_ref, x_ref, xp_ref, w_ref,
                       sr_ref, sr2_ref, sa_ref, sa2_ref):
    # b_ref : SMEM (2,)  [b1, b2]
    # x_ref, xp_ref : (1, C, T) slabs ;  w_ref : (2, C)  [w1 ; w2]
    # s*_ref : (1, 1, T) per-batch accumulators, resident across the spatial grid axis.
    s = pl.program_id(1)

    @pl.when(s == 0)
    def _():
        sr_ref[...] = jnp.zeros_like(sr_ref)
        sr2_ref[...] = jnp.zeros_like(sr2_ref)
        sa_ref[...] = jnp.zeros_like(sa_ref)
        sa2_ref[...] = jnp.zeros_like(sa2_ref)

    x = x_ref[0]                      # (C, T)
    xp = xp_ref[0]                    # (C, T)
    # 1x1 conv == (1, C) @ (C, T) matmul on the MXU.
    rt = jnp.dot(w_ref[0:1, :], x, preferred_element_type=jnp.float32) + b_ref[0]
    at = jnp.dot(w_ref[1:2, :], xp, preferred_element_type=jnp.float32) + b_ref[1]

    sr_ref[0] = sr_ref[0] + rt
    sr2_ref[0] = sr2_ref[0] + rt * rt
    sa_ref[0] = sa_ref[0] + at
    sa2_ref[0] = sa2_ref[0] + at * at


# ------------------------------ pass 2: gates + combine --------------------------------

def _gfrm_apply_kernel(p_ref, x_ref, xp_ref, w_ref, o_ref):
    # p_ref : SMEM (8,) [b1, b2, mean_r, -1/(2 var_r), 1/(sqrt(2pi) std_r),
    #                             mean_a, -1/(2 var_a), 1/(sqrt(2pi) std_a)]
    x = x_ref[0]                      # (C, T)
    xp = xp_ref[0]                    # (C, T)

    # Recompute the cheap gate matmuls (negligible next to the slabs' HBM traffic).
    rt = jnp.dot(w_ref[0:1, :], x, preferred_element_type=jnp.float32) + p_ref[0]
    at = jnp.dot(w_ref[1:2, :], xp, preferred_element_type=jnp.float32) + p_ref[1]

    dr = rt - p_ref[2]
    rt_g = jnp.exp(dr * dr * p_ref[3]) * p_ref[4]     # (1, T) GaussProjection(rt)
    da = at - p_ref[5]
    at_g = jnp.exp(da * da * p_ref[6]) * p_ref[7]     # (1, T) GaussProjection(at)

    # out = x + rt_g*x_ - at_g*x  ==  x*(1 - at_g) + rt_g*x_   (gates broadcast over C)
    o_ref[0] = x * (1.0 - at_g) + rt_g * xp


def gfrm_cell(x, x_, m, w1, b1, w2, b2):
    """x, x_, m: (B, 64, H, W) NCHW. w1/w2: (1, 64, 1, 1); b1/b2: (1,)."""
    del m  # unused by the reference forward
    B, C, H, W = x.shape
    S = H * W
    T = _pick_spatial_tile(S)
    ns = S // T
    grid = (B, ns)

    x3 = x.reshape(B, C, S).astype(jnp.float32)        # free reshape, no transpose
    xp3 = x_.reshape(B, C, S).astype(jnp.float32)
    w = jnp.concatenate([w1.reshape(1, C), w2.reshape(1, C)], axis=0).astype(jnp.float32)
    bvec = jnp.concatenate([b1.reshape(1), b2.reshape(1)]).astype(jnp.float32)

    slab_spec = pl.BlockSpec((1, C, T), lambda b, s: (b, 0, s))
    w_spec = pl.BlockSpec((2, C), lambda b, s: (0, 0))
    smem_spec = pl.BlockSpec(memory_space=pltpu.MemorySpace.SMEM)
    acc_spec = pl.BlockSpec((1, 1, T), lambda b, s: (b, 0, 0))
    acc_shape = jax.ShapeDtypeStruct((B, 1, T), jnp.float32)

    # ---- pass 1: tiled partial sums for the global mean/std of rt and at ----
    sr, sr2, sa, sa2 = pl.pallas_call(
        _gfrm_stats_kernel,
        grid=grid,
        in_specs=[smem_spec, slab_spec, slab_spec, w_spec],
        out_specs=[acc_spec, acc_spec, acc_spec, acc_spec],
        out_shape=[acc_shape, acc_shape, acc_shape, acc_shape],
        compiler_params=pltpu.CompilerParams(
            dimension_semantics=("parallel", "arbitrary"),
            vmem_limit_bytes=32 * 1024 * 1024),
    )(bvec, x3, xp3, w)

    # Finalize global statistics (scalar ops in the wrapper; torch.std is unbiased).
    n = float(B * S)
    sum_r, sumsq_r = jnp.sum(sr), jnp.sum(sr2)
    sum_a, sumsq_a = jnp.sum(sa), jnp.sum(sa2)
    mean_r = sum_r / n
    mean_a = sum_a / n
    var_r = (sumsq_r - n * mean_r * mean_r) / (n - 1.0)
    var_a = (sumsq_a - n * mean_a * mean_a) / (n - 1.0)
    std_r = jnp.sqrt(var_r)
    std_a = jnp.sqrt(var_a)
    params = jnp.stack([
        bvec[0], bvec[1],
        mean_r, -0.5 / var_r, 1.0 / (_SQRT_2PI * std_r),
        mean_a, -0.5 / var_a, 1.0 / (_SQRT_2PI * std_a),
    ]).astype(jnp.float32)

    # ---- pass 2: apply the Gauss gates and combine (fully parallel over the grid) ----
    out3 = pl.pallas_call(
        _gfrm_apply_kernel,
        grid=grid,
        in_specs=[smem_spec, slab_spec, slab_spec, w_spec],
        out_specs=pl.BlockSpec((1, C, T), lambda b, s: (b, 0, s)),
        out_shape=jax.ShapeDtypeStruct((B, C, S), jnp.float32),
        compiler_params=pltpu.CompilerParams(
            dimension_semantics=("parallel", "parallel"),
            vmem_limit_bytes=32 * 1024 * 1024),
    )(params, x3, xp3, w)

    return out3.reshape(B, C, H, W)


def conv_gfrm(all_input, w1, b1, w2, b2):
    """ConvGFRM.forward: y[m] = GFRMCell(all_input[m], sum(other inputs), m).

    The PyTorch module builds `[GFRMCell()] * num`, i.e. a single shared cell, so one
    (w1, b1, w2, b2) parameter set is used for every m.
    """
    num = len(all_input)
    ys = []
    for mi in range(num):
        others = all_input[:mi] + all_input[mi + 1:]
        if others:
            x_ = others[0]
            for o in others[1:]:
                x_ = x_ + o
        else:
            x_ = jnp.zeros_like(all_input[mi])
        ys.append(gfrm_cell(all_input[mi], x_, mi, w1, b1, w2, b2))
    return ys


# ---------------------------------- pure-JAX reference ----------------------------------

def _reference_cell(x, x_, w1, b1, w2, b2):
    def conv1x1(inp, w, b):
        return jnp.einsum("bchw,c->bhw", inp, w.reshape(-1))[:, None, :, :] \
            + b.reshape(1, 1, 1, 1)

    def gauss(v):
        mean = jnp.mean(v)
        std = jnp.std(v, ddof=1)          # torch.std default: unbiased
        sigma = _SQRT_2PI * std
        return jnp.exp(-(v - mean) ** 2 / (2.0 * std ** 2)) / sigma

    rt = gauss(conv1x1(x, w1, b1)) * x_
    at = gauss(conv1x1(x_, w2, b2)) * x
    return x + rt - at


def _reference(all_input, w1, b1, w2, b2):
    ys = []
    for mi in range(len(all_input)):
        others = all_input[:mi] + all_input[mi + 1:]
        x_ = others[0]
        for o in others[1:]:
            x_ = x_ + o
        ys.append(_reference_cell(all_input[mi], x_, w1, b1, w2, b2))
    return ys


if __name__ == "__main__":
    B, C, H, W = 2, 64, 16, 16        # C is fixed to 64 by the module definition
    NUM = 2                            # ConvGFRM(num=2)

    key = jax.random.PRNGKey(0)
    keys = jax.random.split(key, NUM + 4)
    all_input = [jax.random.normal(keys[i], (B, C, H, W), dtype=jnp.float32)
                 for i in range(NUM)]

    # Deterministic synthetic Conv2d(64, 1, 1) parameters (PyTorch default init range).
    bound = 1.0 / math.sqrt(C)
    w1 = jax.random.uniform(keys[NUM + 0], (1, C, 1, 1), jnp.float32, -bound, bound)
    b1 = jax.random.uniform(keys[NUM + 1], (1,), jnp.float32, -bound, bound)
    w2 = jax.random.uniform(keys[NUM + 2], (1, C, 1, 1), jnp.float32, -bound, bound)
    b2 = jax.random.uniform(keys[NUM + 3], (1,), jnp.float32, -bound, bound)

    ys = conv_gfrm(all_input, w1, b1, w2, b2)
    ys = jax.block_until_ready(ys)

    refs = _reference(all_input, w1, b1, w2, b2)
    for y, r in zip(ys, refs):
        np.testing.assert_allclose(np.asarray(y), np.asarray(r), rtol=2e-4, atol=5e-5)

    print("KERNEL_OK")
</pallas_src>

<mosaic_0001>
module attributes {stable_mosaic.version = 11 : i64} {
  func.func @_gfrm_stats_kernel(%arg0: i32, %arg1: i32, %arg2: memref<2xf32, #tpu.memory_space<smem>>, %arg3: memref<1x64x256xf32, #tpu.memory_space<vmem>>, %arg4: memref<1x64x256xf32, #tpu.memory_space<vmem>>, %arg5: memref<2x64xf32, #tpu.memory_space<vmem>>, %arg6: memref<1x1x256xf32, #tpu.memory_space<vmem>>, %arg7: memref<1x1x256xf32, #tpu.memory_space<vmem>>, %arg8: memref<1x1x256xf32, #tpu.memory_space<vmem>>, %arg9: memref<1x1x256xf32, #tpu.memory_space<vmem>>) attributes {dimension_semantics = [#tpu.dimension_semantics<parallel>, #tpu.dimension_semantics<arbitrary>], iteration_bounds = array<i64: 2, 1>, scalar_prefetch = 0 : i64, scratch_operands = 0 : i64, tpu.core_type = #tpu.core_type<tc>, window_params = [{transform_indices = @transform_0, window_bounds = array<i64: 2>}, {transform_indices = @transform_1, window_bounds = array<i64: 1, 64, 256>}, {transform_indices = @transform_2, window_bounds = array<i64: 1, 64, 256>}, {pipeline_mode = #tpu.pipeline_mode<synchronous>, transform_indices = @transform_3, window_bounds = array<i64: 2, 64>}, {transform_indices = @transform_4, window_bounds = array<i64: 1, 1, 256>}, {transform_indices = @transform_5, window_bounds = array<i64: 1, 1, 256>}, {transform_indices = @transform_6, window_bounds = array<i64: 1, 1, 256>}, {transform_indices = @transform_7, window_bounds = array<i64: 1, 1, 256>}]} {
    %c0_i32 = arith.constant 0 : i32
    %0 = arith.cmpi eq, %arg1, %c0_i32 : i32
    %1 = arith.extui %0 : i1 to i32
    %c0_i32_0 = arith.constant 0 : i32
    %2 = arith.cmpi ne, %1, %c0_i32_0 : i32
    scf.if %2 {
      %cst_36 = arith.constant 0.000000e+00 : f32
      %43 = vector.broadcast %cst_36 : f32 to vector<1x1x256xf32>
      %c0_37 = arith.constant 0 : index
      %c0_38 = arith.constant 0 : index
      %c0_39 = arith.constant 0 : index
      %44 = vector.load %arg6[%c0_37, %c0_38, %c0_39] : memref<1x1x256xf32, #tpu.memory_space<vmem>>, vector<1x1x256xf32>
      tpu.vector_store %arg6[%c0_37, %c0_38, %c0_39], %43 {strides = array<i32>} : memref<1x1x256xf32, #tpu.memory_space<vmem>>, vector<1x1x256xf32>,
      %cst_40 = arith.constant 0.000000e+00 : f32
      %45 = vector.broadcast %cst_40 : f32 to vector<1x1x256xf32>
      %c0_41 = arith.constant 0 : index
      %c0_42 = arith.constant 0 : index
      %c0_43 = arith.constant 0 : index
      %46 = vector.load %arg7[%c0_41, %c0_42, %c0_43] : memref<1x1x256xf32, #tpu.memory_space<vmem>>, vector<1x1x256xf32>
      tpu.vector_store %arg7[%c0_41, %c0_42, %c0_43], %45 {strides = array<i32>} : memref<1x1x256xf32, #tpu.memory_space<vmem>>, vector<1x1x256xf32>,
      %cst_44 = arith.constant 0.000000e+00 : f32
      %47 = vector.broadcast %cst_44 : f32 to vector<1x1x256xf32>
      %c0_45 = arith.constant 0 : index
      %c0_46 = arith.constant 0 : index
      %c0_47 = arith.constant 0 : index
      %48 = vector.load %arg8[%c0_45, %c0_46, %c0_47] : memref<1x1x256xf32, #tpu.memory_space<vmem>>, vector<1x1x256xf32>
      tpu.vector_store %arg8[%c0_45, %c0_46, %c0_47], %47 {strides = array<i32>} : memref<1x1x256xf32, #tpu.memory_space<vmem>>, vector<1x1x256xf32>,
      %cst_48 = arith.constant 0.000000e+00 : f32
      %49 = vector.broadcast %cst_48 : f32 to vector<1x1x256xf32>
      %c0_49 = arith.constant 0 : index
      %c0_50 = arith.constant 0 : index
      %c0_51 = arith.constant 0 : index
      %50 = vector.load %arg9[%c0_49, %c0_50, %c0_51] : memref<1x1x256xf32, #tpu.memory_space<vmem>>, vector<1x1x256xf32>
      tpu.vector_store %arg9[%c0_49, %c0_50, %c0_51], %49 {strides = array<i32>} : memref<1x1x256xf32, #tpu.memory_space<vmem>>, vector<1x1x256xf32>,
    } else {
    }
    %c0 = arith.constant 0 : index
    %c0_1 = arith.constant 0 : index
    %c0_2 = arith.constant 0 : index
    %3 = vector.load %arg3[%c0, %c0_1, %c0_2] : memref<1x64x256xf32, #tpu.memory_space<vmem>>, vector<1x64x256xf32>
    %4 = vector.shape_cast %3 : vector<1x64x256xf32> to vector<64x256xf32>
    %c0_3 = arith.constant 0 : index
    %c0_4 = arith.constant 0 : index
    %c0_5 = arith.constant 0 : index
    %5 = vector.load %arg4[%c0_3, %c0_4, %c0_5] : memref<1x64x256xf32, #tpu.memory_space<vmem>>, vector<1x64x256xf32>
    %6 = vector.shape_cast %5 : vector<1x64x256xf32> to vector<64x256xf32>
    %c0_6 = arith.constant 0 : index
    %c0_7 = arith.constant 0 : index
    %7 = vector.load %arg5[%c0_6, %c0_7] : memref<2x64xf32, #tpu.memory_space<vmem>>, vector<1x64xf32>
    %cst = arith.constant dense<0.000000e+00> : vector<1x256xf32>
    %8 = tpu.matmul %7, %4, %cst {dimension_numbers = #tpu.dot_dimension_numbers<[1], [0], [0], [1], [0, 0, 1, 1], [], []>} : vector<1x64xf32>, vector<64x256xf32>, vector<1x256xf32> -> vector<1x256xf32>
    %c0_8 = arith.constant 0 : index
    %9 = memref.load %arg2[%c0_8] : memref<2xf32, #tpu.memory_space<smem>>
    %10 = vector.broadcast %9 : f32 to vector<1x256xf32>
    %11 = arith.addf %8, %10 : vector<1x256xf32>
    %c1 = arith.constant 1 : index
    %c0_9 = arith.constant 0 : index
    %12 = vector.load %arg5[%c1, %c0_9] : memref<2x64xf32, #tpu.memory_space<vmem>>, vector<1x64xf32>
    %cst_10 = arith.constant dense<0.000000e+00> : vector<1x256xf32>
    %13 = tpu.matmul %12, %6, %cst_10 {dimension_numbers = #tpu.dot_dimension_numbers<[1], [0], [0], [1], [0, 0, 1, 1], [], []>} : vector<1x64xf32>, vector<64x256xf32>, vector<1x256xf32> -> vector<1x256xf32>
    %c1_11 = arith.constant 1 : index
    %14 = memref.load %arg2[%c1_11] : memref<2xf32, #tpu.memory_space<smem>>
    %15 = vector.broadcast %14 : f32 to vector<1x256xf32>
    %16 = arith.addf %13, %15 : vector<1x256xf32>
    %c0_12 = arith.constant 0 : index
    %c0_13 = arith.constant 0 : index
    %c0_14 = arith.constant 0 : index
    %17 = vector.load %arg6[%c0_12, %c0_13, %c0_14] : memref<1x1x256xf32, #tpu.memory_space<vmem>>, vector<1x1x256xf32>
    %18 = vector.shape_cast %17 : vector<1x1x256xf32> to vector<1x256xf32>
    %19 = arith.addf %18, %11 : vector<1x256xf32>
    %c0_15 = arith.constant 0 : index
    %c0_16 = arith.constant 0 : index
    %c0_17 = arith.constant 0 : index
    %20 = vector.load %arg6[%c0_15, %c0_16, %c0_17] : memref<1x1x256xf32, #tpu.memory_space<vmem>>, vector<1x1x256xf32>
    %21 = vector.shape_cast %20 : vector<1x1x256xf32> to vector<1x256xf32>
    %22 = vector.shape_cast %19 : vector<1x256xf32> to vector<1x1x256xf32>
    tpu.vector_store %arg6[%c0_15, %c0_16, %c0_17], %22 {strides = array<i32>} : memref<1x1x256xf32, #tpu.memory_space<vmem>>, vector<1x1x256xf32>,
    %c0_18 = arith.constant 0 : index
    %c0_19 = arith.constant 0 : index
    %c0_20 = arith.constant 0 : index
    %23 = vector.load %arg7[%c0_18, %c0_19, %c0_20] : memref<1x1x256xf32, #tpu.memory_space<vmem>>, vector<1x1x256xf32>
    %24 = vector.shape_cast %23 : vector<1x1x256xf32> to vector<1x256xf32>
    %25 = arith.mulf %11, %11 : vector<1x256xf32>
    %26 = arith.addf %24, %25 : vector<1x256xf32>
    %c0_21 = arith.constant 0 : index
    %c0_22 = arith.constant 0 : index
    %c0_23 = arith.constant 0 : index
    %27 = vector.load %arg7[%c0_21, %c0_22, %c0_23] : memref<1x1x256xf32, #tpu.memory_space<vmem>>, vector<1x1x256xf32>
    %28 = vector.shape_cast %27 : vector<1x1x256xf32> to vector<1x256xf32>
    %29 = vector.shape_cast %26 : vector<1x256xf32> to vector<1x1x256xf32>
    tpu.vector_store %arg7[%c0_21, %c0_22, %c0_23], %29 {strides = array<i32>} : memref<1x1x256xf32, #tpu.memory_space<vmem>>, vector<1x1x256xf32>,
    %c0_24 = arith.constant 0 : index
    %c0_25 = arith.constant 0 : index
    %c0_26 = arith.constant 0 : index
    %30 = vector.load %arg8[%c0_24, %c0_25, %c0_26] : memref<1x1x256xf32, #tpu.memory_space<vmem>>, vector<1x1x256xf32>
    %31 = vector.shape_cast %30 : vector<1x1x256xf32> to vector<1x256xf32>
    %32 = arith.addf %31, %16 : vector<1x256xf32>
    %c0_27 = arith.constant 0 : index
    %c0_28 = arith.constant 0 : index
    %c0_29 = arith.constant 0 : index
    %33 = vector.load %arg8[%c0_27, %c0_28, %c0_29] : memref<1x1x256xf32, #tpu.memory_space<vmem>>, vector<1x1x256xf32>
    %34 = vector.shape_cast %33 : vector<1x1x256xf32> to vector<1x256xf32>
    %35 = vector.shape_cast %32 : vector<1x256xf32> to vector<1x1x256xf32>
    tpu.vector_store %arg8[%c0_27, %c0_28, %c0_29], %35 {strides = array<i32>} : memref<1x1x256xf32, #tpu.memory_space<vmem>>, vector<1x1x256xf32>,
    %c0_30 = arith.constant 0 : index
    %c0_31 = arith.constant 0 : index
    %c0_32 = arith.constant 0 : index
    %36 = vector.load %arg9[%c0_30, %c0_31, %c0_32] : memref<1x1x256xf32, #tpu.memory_space<vmem>>, vector<1x1x256xf32>
    %37 = vector.shape_cast %36 : vector<1x1x256xf32> to vector<1x256xf32>
    %38 = arith.mulf %16, %16 : vector<1x256xf32>
    %39 = arith.addf %37, %38 : vector<1x256xf32>
    %c0_33 = arith.constant 0 : index
    %c0_34 = arith.constant 0 : index
    %c0_35 = arith.constant 0 : index
    %40 = vector.load %arg9[%c0_33, %c0_34, %c0_35] : memref<1x1x256xf32, #tpu.memory_space<vmem>>, vector<1x1x256xf32>
    %41 = vector.shape_cast %40 : vector<1x1x256xf32> to vector<1x256xf32>
    %42 = vector.shape_cast %39 : vector<1x256xf32> to vector<1x1x256xf32>
    tpu.vector_store %arg9[%c0_33, %c0_34, %c0_35], %42 {strides = array<i32>} : memref<1x1x256xf32, #tpu.memory_space<vmem>>, vector<1x1x256xf32>,
    return
  }
  func.func @transform_0(%arg0: i32, %arg1: i32) -> i32 {
    %c0_i32 = arith.constant 0 : i32
    %c0_i32_0 = arith.constant 0 : i32
    return %c0_i32 : i32
  }
  func.func @transform_1(%arg0: i32, %arg1: i32) -> (i32, i32, i32) {
    %c0_i32 = arith.constant 0 : i32
    %c0_i32_0 = arith.constant 0 : i32
    return %arg0, %c0_i32, %arg1 : i32, i32, i32
  }
  func.func @transform_2(%arg0: i32, %arg1: i32) -> (i32, i32, i32) {
    %c0_i32 = arith.constant 0 : i32
    %c0_i32_0 = arith.constant 0 : i32
    return %arg0, %c0_i32, %arg1 : i32, i32, i32
  }
  func.func @transform_3(%arg0: i32, %arg1: i32) -> (i32, i32) {
    %c0_i32 = arith.constant 0 : i32
    %c0_i32_0 = arith.constant 0 : i32
    %c0_i32_1 = arith.constant 0 : i32
    return %c0_i32, %c0_i32_0 : i32, i32
  }
  func.func @transform_4(%arg0: i32, %arg1: i32) -> (i32, i32, i32) {
    %c0_i32 = arith.constant 0 : i32
    %c0_i32_0 = arith.constant 0 : i32
    %c0_i32_1 = arith.constant 0 : i32
    return %arg0, %c0_i32, %c0_i32_0 : i32, i32, i32
  }
  func.func @transform_5(%arg0: i32, %arg1: i32) -> (i32, i32, i32) {
    %c0_i32 = arith.constant 0 : i32
    %c0_i32_0 = arith.constant 0 : i32
    %c0_i32_1 = arith.constant 0 : i32
    return %arg0, %c0_i32, %c0_i32_0 : i32, i32, i32
  }
  func.func @transform_6(%arg0: i32, %arg1: i32) -> (i32, i32, i32) {
    %c0_i32 = arith.constant 0 : i32
    %c0_i32_0 = arith.constant 0 : i32
    %c0_i32_1 = arith.constant 0 : i32
    return %arg0, %c0_i32, %c0_i32_0 : i32, i32, i32
  }
  func.func @transform_7(%arg0: i32, %arg1: i32) -> (i32, i32, i32) {
    %c0_i32 = arith.constant 0 : i32
    %c0_i32_0 = arith.constant 0 : i32
    %c0_i32_1 = arith.constant 0 : i32
    return %arg0, %c0_i32, %c0_i32_0 : i32, i32, i32
  }
}

</mosaic_0001>

<bundles_post_ra>
// kernel: tpu_custom_call.1
= control target key start
LH: loop header
LB: loop body
LE: loop exit
PB: predicated region body
PF: predicated region fallthrough
CT: control target
= control target key end

     0   :  { %s1914_s0 = inlined_call_operand.hbm [shape: f32[2], index: 0, kind: input, shape index: {}]   ;;  %s1915_s1 = inlined_call_operand.hbm [shape: f32[2,64,256], index: 1, kind: input, shape index: {}]   ;;  %s1916_s2 = inlined_call_operand.hbm [shape: f32[2,64,256], index: 2, kind: input, shape index: {}]   ;;  %s1917_s3 = inlined_call_operand.vmem [shape: f32[2,64], index: 3, kind: input, shape index: {}]   ;;  %s1918_s4 = inlined_call_operand.hbm [shape: f32[2,1,256], index: 4, kind: output, shape index: {0}]   ;;  %s1919_s5 = inlined_call_operand.hbm [shape: f32[2,1,256], index: 5, kind: output, shape index: {1}]   ;;  %s1920_s6 = inlined_call_operand.hbm [shape: f32[2,1,256], index: 6, kind: output, shape index: {2}]   ;;  %s1921_s7 = inlined_call_operand.hbm [shape: f32[2,1,256], index: 7, kind: output, shape index: {3}]  }
   0x1   :  { %1930 = sst [smem:[#allocation25_spill]] %s1914_s0 }
   0x2   :  { %1931 = sst [smem:[#allocation26_spill]] %s1915_s1 }
   0x3   :  { %13 = vsyncpa [#allocation5], 0 }
   0x4   :  { %14 = vsyncpa [#allocation3], 0 }
   0x5   :  { %16 = vsyncpa [#allocation3 + $0x1], 0 }
   0x6   :  { %17 = vsyncpa [#allocation8], 0 }
   0x7   :  { %19 = vsyncpa [#allocation8 + $0x1], 0 }
   0x8   :  { %20 = vsyncpa [#allocation4], 0 }
   0x9   :  { %22 = vsyncpa [#allocation4 + $0x1], 0 }
   0xa   :  { %23 = vsyncpa [#allocation11], 0 }
   0xb   :  { %25 = vsyncpa [#allocation11 + $0x1], 0 }
   0xc   :  { %26 = vsyncpa [#allocation14], 0 }
   0xd   :  { %28 = vsyncpa [#allocation14 + $0x1], 0  ;;  %s1453_s24 = smov 0   ;;  %s1455_s25 = smov 0  }
   0xe   :  { %s1457_s26 = smov 0   ;;  %s1459_s27 = smov 0  }
   0xf   :  { %s1461_s28 = smov 0   ;;  %s1463_s29 = smov 0  }
  0x10 LB: > { %1932 = sst [smem:[#allocation21_spill]] %s1388_s26  ;;  %s1484_s30 = sadd.s32 4294967295, %s1400_s29   ;;  %s1400_s29 = sphi %s1463_s29, %s34_s29   ;;  %s1396_s28 = sphi %s1461_s28, %s1964_s28   ;;  %s1392_s27 = sphi %s1459_s27, %s1963_s27   ;;  %s1388_s26 = sphi %s1457_s26, %s1959_s26   ;;  %s1384_s25 = sphi %s1455_s25, %s1962_s25   ;;  %s1380_s24 = sphi %s1453_s24, %s1961_s24  }
  0x11   : > { %1933 = sst [smem:[#allocation22_spill]] %s1400_s29  ;;  %s1922_s8 = sadd.s32 4294967294, %s1400_s29  }
  0x12   : > { %p83_p0 = scmp.ne.s32.totalorder %s1388_s26, %s1384_s25  ;;  %p84_p1 = scmp.eq.s32.totalorder %s1400_s29, 0 }
  0x13   : > { %p89_p2 = scmp.ne.s32.totalorder %s1384_s25, %s1380_s24  ;;  %p1926_p3 = scmp.eq.s32.totalorder %s1484_s30, 0 }
  0x14   : > { %p162_p4 = scmp.eq.s32.totalorder %s1484_s30, 1  ;;  %p85_p5 = por %p84_p1, %p83_p0 }
  0x15   : > { %p168_p6 = scmp.eq.s32.totalorder %s1922_s8, 1  ;;  %p1499_p7 = por %p1926_p3, %p89_p2 }
  0x16   : > { %p1503_p8 = por %p162_p4, %p83_p0  ;;  %p976_p10 = scmp.ge.s32.totalorder %s1400_s29, 1 }
  0x17   : > { %s1934_s10 = scalar_select %p1499_p7, 1, 0 }
  0x18   : > { %s1935_s11 = scalar_select %p1503_p8, 1, 0 }
  0x19   : > { %p1507_p9 = por %p168_p6, %p89_p2  ;;  %p253_p11 = scmp.lt.s32.totalorder %s1400_s29, 3 }
  0x1a   : > { %p1089_p1 = scmp.lt.s32.totalorder %s1400_s29, 2  ;;  %s1520_s14 = sand.u32 1, %s1388_s26  }
  0x1b   : > { %s1936_s12 = scalar_select %p1507_p9, 1, 0 }
  0x1c   : > { %p1514_p13 = pnand %p976_p10, %p253_p11  ;;  %p1524_p4 = pnand %p1089_p1, %p85_p5 }
  0x1d   : > { %s46_s16 = sadd.s32 1, %s1396_s28  ;;  %s1939_s0 = sld [smem:[#allocation25_spill]] }
  0x1e   : > { %p1064_p0 = pneg %p1514_p13  ;;  %p48_p6 = scmp.ge.s32.totalorder %s46_s16, 2 }
  0x20   : > { %p1065_p2 = pnand %p1064_p0, %p1926_p3 }
  0x22   : > { %p1147_p11 = pneg %p1065_p2 }
  0x23   : > { %s1145_s20 = scalar_lea.hbm %s1939_s0, 16 }
  0x24   : > { %p1146_p10 = scmp.ne.s32.totalorder %s1939_s0, %s1145_s20  ;;  %p1152_p5 = scmp.lt.u32.totalorder %s1145_s20, %s1939_s0 }
  0x26   : > { %p1148_p12 = pnand %p1147_p11, %p1146_p10 }
  0x28   : > { %p1149_p9 = pneg %p1148_p12 }
  0x2a   : > { %p1154_p1 = pnand %p1152_p5, %p1149_p9 }
  0x2c   : > { %1157 = shalt.err (!%p1154_p1)
}
  0x2d   : > { %s1402_s9 = smov [#allocation2]   ;;  %s1966_s16 = smov (%p48_p6, %s46_s16), 0 }
  0x2e   : > { %1067 = dma.hbm_to_smem (!%p1065_p2), %s1939_s0, 16, %s1402_s9, [#allocation5]  }
  0x2f   : > { %1940 = sst [smem:[#allocation23_spill]] %s1966_s16  ;;  %s1010_s8 = sshll.u32 %s1396_s28, 11 }
  0x30   : > { %s71_s18 = ssub.s32 %s1396_s28, %s1966_s16  ;;  %s1941_s1 = sld [smem:[#allocation26_spill]] }
  0x31   : > { %p74_p9 = scmp.eq.s32.totalorder %s71_s18, 0  ;;  %s1942_s17 = sshll.u32 %s1520_s14, 7 }
  0x32   : > { %s282_s21 = scalar_lea.vmem [#allocation6], %s1942_s17  ;;  %s1943_s9 = sadd.s32 1, %s1388_s26 }
  0x33   : > { %s291_s22 = sshll.u32 %s282_s21, 4  ;;  %s279_s0 = scalar_lea.sflag [#allocation3], %s1520_s14  ;;  %s1558_s22 = int_to_ptr.vmem [resolvable:$true] %s291_s22 }
  0x34   : > { %s1563_s23 = scalar_select %p74_p9, %s1388_s26, %s1943_s9  }
  0x35   : > { %p1160_p0 = pneg %p1524_p4 }
  0x36   : > { %s1554_s29 = scalar_lea.hbm %s1941_s1, %s1010_s8  ;;  %1944 = sst [smem:[#allocation24_spill]] %s1563_s23 }
  0x37   : > { %s1158_s16 = scalar_lea.hbm %s1554_s29, 2048  ;;  %s1163_s18 = scalar_lea.hbm %s1941_s1, 4096 }
  0x38   : > { %p1159_p12 = scmp.ne.s32.totalorder %s1554_s29, %s1158_s16  ;;  %p1164_p10 = scmp.lt.u32.totalorder %s1554_s29, %s1941_s1 }
  0x39   : > { %p1165_p11 = scmp.lt.u32.totalorder %s1163_s18, %s1158_s16  ;;  %p1167_p1 = scmp.lt.u32.totalorder %s1158_s16, %s1554_s29 }
  0x3a   : > { %p1161_p2 = pnand %p1160_p0, %p1159_p12 }
  0x3b   : > { %p1166_p5 = por %p1165_p11, %p1164_p10 }
  0x3c   : > { %p1162_p6 = pneg %p1161_p2 }
  0x3d   : > { %p1168_p9 = por %p1167_p1, %p1166_p5 }
  0x3f   : > { %p1169_p3 = pnand %p1168_p9, %p1162_p6 }
  0x41   : > { %1172 = shalt.err (!%p1169_p3)
}
  0x42   : > { %s1173_s9 = scalar_lea.vmem %s1558_s22, 2048  ;;  %s1403_s19 = smov [#allocation6]  }
  0x43   : > { %p1174_p12 = scmp.ne.s32.totalorder %s1558_s22, %s1173_s9  ;;  %s1178_s20 = sshll.u32 %s1403_s19, 4  ;;  %s1179_s20 = int_to_ptr.vmem [resolvable:$false] %s1178_s20 }
  0x44   : > { %s1180_s17 = scalar_lea.vmem %s1179_s20, 4096  ;;  %p1181_p7 = scmp.lt.s32.totalorder %s1558_s22, %s1179_s20 }
  0x45   : > { %p1176_p2 = pnand %p1174_p12, %p1160_p0  ;;  %p1182_p10 = scmp.lt.s32.totalorder %s1180_s17, %s1173_s9 }
  0x47   : > { %p1177_p8 = pneg %p1176_p2  ;;  %p1183_p11 = por %p1182_p10, %p1181_p7 }
  0x49   : > { %p1184_p5 = pnand %p1183_p11, %p1177_p8 }
  0x4b   : > { %1187 = shalt.err (!%p1184_p5)
}
  0x4c   : > { %s1404_s16 = smov 256   ;;  %s1405_s18 = smov 16  }
  0x4d   : > { %1071 = dma.hbm_to_vmem [thread:$0]  (!%p1524_p4), %s1554_s29, 2048, %s1558_s22, %s279_s0, %s1404_s16, %s1404_s16, %s1405_s18  }
  0x4e   : > { %s1601_s19 = scalar_lea.hbm %s1916_s2, %s1010_s8  ;;  %s1945_s20 = sshll.u32 %s1520_s14, 7 }
  0x4f   : > { %s305_s17 = scalar_lea.vmem [#allocation7], %s1945_s20  ;;  %s302_s23 = scalar_lea.sflag [#allocation8], %s1520_s14 }
  0x50   : > { %s314_s1 = sshll.u32 %s305_s17, 4  ;;  %s1188_s26 = scalar_lea.hbm %s1601_s19, 2048  ;;  %s1605_s1 = int_to_ptr.vmem [resolvable:$true] %s314_s1 }
  0x51   : > { %p1189_p3 = scmp.ne.s32.totalorder %s1601_s19, %s1188_s26  ;;  %s1193_s8 = scalar_lea.hbm %s1916_s2, 4096 }
  0x52   : > { %p1194_p6 = scmp.lt.u32.totalorder %s1601_s19, %s1916_s2  ;;  %p1195_p1 = scmp.lt.u32.totalorder %s1193_s8, %s1188_s26 }
  0x53   : > { %p1191_p7 = pnand %p1189_p3, %p1160_p0  ;;  %p1197_p12 = scmp.lt.u32.totalorder %s1188_s26, %s1601_s19 }
  0x54   : > { %p1196_p9 = por %p1195_p1, %p1194_p6 }
  0x55   : > { %p1192_p8 = pneg %p1191_p7 }
  0x56   : > { %p1198_p2 = por %p1197_p12, %p1196_p9 }
  0x58   : > { %p1199_p10 = pnand %p1198_p2, %p1192_p8 }
  0x5a   : > { %1202 = shalt.err (!%p1199_p10)
}
  0x5b   : > { %s1203_s9 = scalar_lea.vmem %s1605_s1, 2048  ;;  %s1406_s20 = smov [#allocation7]  }
  0x5c   : > { %p1204_p11 = scmp.ne.s32.totalorder %s1605_s1, %s1203_s9  ;;  %s1208_s17 = sshll.u32 %s1406_s20, 4  ;;  %s1209_s17 = int_to_ptr.vmem [resolvable:$false] %s1208_s17 }
  0x5d   : > { %s1210_s0 = scalar_lea.vmem %s1209_s17, 4096  ;;  %p1211_p7 = scmp.lt.s32.totalorder %s1605_s1, %s1209_s17 }
  0x5e   : > { %p1206_p5 = pnand %p1204_p11, %p1160_p0  ;;  %p1212_p6 = scmp.lt.s32.totalorder %s1210_s0, %s1203_s9 }
  0x60   : > { %p1207_p3 = pneg %p1206_p5  ;;  %p1213_p1 = por %p1212_p6, %p1211_p7 }
  0x62   : > { %p1214_p9 = pnand %p1213_p1, %p1207_p3 }
  0x64   : > { %1217 = shalt.err (!%p1214_p9)
}
  0x65   : > { %1074 = dma.hbm_to_vmem [thread:$0]  (!%p1524_p4), %s1601_s19, 2048, %s1605_s1, %s302_s23, %s1404_s16, %s1404_s16, %s1405_s18  }
  0x66   : > { %326 = sbr.rel (%p1514_p13) target bundleno = 445 (0x1bd), region = 36  ;;  %p1946_p0 = scmp.eq.s32.totalorder (!%p1514_p13), %s1484_s30, 0 }
  0x6d   : > { %1355 = dma.done.wait (%p1946_p0), [#allocation5], 16   ;;  %p1947_p8 = pmov %p1946_p0 }
  0x6e   : > { %s1643_s26 = sand.u32 1, %s1384_s25   ;;  %p1948_p4 = scmp.ne.s32.totalorder %s1934_s10, 0 }
  0x6f   : > { %1357 = vsyncadd (%p1947_p8), [#allocation5], 4294967280  ;;  %s987_s15 = sshll.u32 %s1643_s26, 7  ;;  %s333_s14 = scalar_lea.sflag [#allocation3], %s1643_s26 }
  0x70   : > { %s1647_s29 = scalar_lea.vmem [#allocation6], %s987_s15 }
  0x71   : > { %1359 = dma.done.wait (%p1948_p4), %s333_s14, 2048  }
  0x72   : > { %1361 = vsyncadd (%p1948_p4), %s333_s14, 4294965248  ;;  %s342_s1 = scalar_lea.sflag [#allocation8], %s1643_s26  ;;  %s1654_s13 = scalar_lea.vmem [#allocation7], %s987_s15 }
  0x73   : > { %1363 = dma.done.wait (%p1948_p4), %s342_s1, 2048  }
  0x74   : > { %1365 = vsyncadd (%p1948_p4), %s342_s1, 4294965248 }
  0x75   : > { %350 = sfence }
  0x76   : > { %v412_v0 = vld [vmem:[%s1647_s29 + $0x8] sm:$0xff]  ;;  %v414_v1 = vld [vmem:[%s1647_s29 + $0x18] sm:$0xff]  ;;  %v411_v5 = vld [vmem:[%s1647_s29] sm:$0xff]  ;;  %v1407_v7 = vmov 0.0   ;;  %vm446_vm0 = vcmask 523264   ;;  %v403_v51 = vlaneseq  ;;  %s989_s19 = sshll.u32 %s1643_s26, 1 }
  0x77   : > { %v428_v2 = vld [vmem:[%s1654_s13 + $0x8] sm:$0xff]  ;;  %v1016_v3 = vpack.c.bf16 %v414_v1, %v412_v0  ;;  %v430_v4 = vld [vmem:[%s1654_s13 + $0x18] sm:$0xff]  ;;  %v413_v6 = vld [vmem:[%s1647_s29 + $0x10] sm:$0xff]  ;;  %514 = vmatprep.mubr.f32.mxu0 %v1407_v7  ;;  %591 = vmatprep.mubr.f32.mxu1 %v1407_v7  ;;  %s1705_s8 = scalar_lea.vmem [#allocation12], %s989_s19  ;;  %s1711_s22 = scalar_lea.vmem [#allocation9], %s989_s19 }
  0x78   : > { %v1032_v8 = vpack.c.bf16 %v430_v4, %v428_v2  ;;  %v1018_v9 = vpack.c.bf16 %v413_v6, %v411_v5  ;;  %v427_v10 = vld [vmem:[%s1654_s13] sm:$0xff]  ;;  %v429_v11 = vld [vmem:[%s1654_s13 + $0x10] sm:$0xff]  ;;  %v416_v12 = vld [vmem:[%s1647_s29 + $0x28] sm:$0xff]  ;;  %vm1701_vm1 = vcmp.lt.s32.totalorder %v403_v51, 256  ;;  %s1717_s21 = scalar_lea.vmem [#allocation10], %s989_s19  ;;  %s1723_s9 = scalar_lea.vmem [#allocation13], %s989_s19 }
  0x79   : > { %1017 = vmatprep.subr.bf16.mxu0 %v1016_v3  ;;  %v1034_v13 = vpack.c.bf16 %v429_v11, %v427_v10  ;;  %v418_v14 = vld [vmem:[%s1647_s29 + $0x38] sm:$0xff]  ;;  %v432_v15 = vld [vmem:[%s1654_s13 + $0x28] sm:$0xff]  ;;  %v415_v19 = vld [vmem:[%s1647_s29 + $0x20] sm:$0xff]  ;;  %409 = vst.msk [vmem:[%s1705_s8] sm:$0x3] %vm1701_vm1, %v1407_v7  ;;  %s444_s20 = sld [smem:[#allocation2]] }
  0x7a   : > { %v434_v16 = vld [vmem:[%s1654_s13 + $0x38] sm:$0xff]  ;;  %1033 = vmatprep.subr.bf16.mxu1 %v1032_v8  ;;  %1019 = vmatpush1.bf16.msra.mxu0 %v1018_v9  ;;  %v1020_v17 = vpack.c.bf16 %v418_v14, %v416_v12  ;;  %v417_v20 = vld [vmem:[%s1647_s29 + $0x30] sm:$0xff]  ;;  %v431_v21 = vld [vmem:[%s1654_s13 + $0x20] sm:$0xff]  ;;  %407 = vst.msk [vmem:[%s1711_s22] sm:$0x3] %vm1701_vm1, %v1407_v7  ;;  %s994_s17 = sld [smem:[#allocation2 + $0x1]] }
  0x7b   : > { %v1036_v18 = vpack.c.bf16 %v434_v16, %v432_v15  ;;  %1035 = vmatpush1.bf16.msra.mxu1 %v1034_v13  ;;  %v1022_v22 = vpack.c.bf16 %v417_v20, %v415_v19  ;;  %v433_v23 = vld [vmem:[%s1654_s13 + $0x30] sm:$0xff]  ;;  %v420_v24 = vld [vmem:[%s1647_s29 + $0x48] sm:$0xff]  ;;  %v422_v25 = vld [vmem:[%s1647_s29 + $0x58] sm:$0xff]  ;;  %408 = vst.msk [vmem:[%s1717_s21] sm:$0x3] %vm1701_vm1, %v1407_v7  ;;  %v606_v57 = vshrl.u32 %v403_v51, 7 }
  0x7c   : > { %1021 = vmatprep.subr.bf16.mxu0 %v1020_v17  ;;  %v1038_v26 = vpack.c.bf16 %v433_v23, %v431_v21  ;;  %v1024_v27 = vpack.c.bf16 %v422_v25, %v420_v24  ;;  %v436_v28 = vld [vmem:[%s1654_s13 + $0x48] sm:$0xff]  ;;  %v438_v29 = vld [vmem:[%s1654_s13 + $0x58] sm:$0xff]  ;;  %v419_v30 = vld [vmem:[%s1647_s29 + $0x40] sm:$0xff]  ;;  %410 = vst.msk [vmem:[%s1723_s9] sm:$0x3] %vm1701_vm1, %v1407_v7  ;;  %s1733_s15 = sshll.u32 %s1392_s27, 5 }
  0x7d   : > { %1037 = vmatprep.subr.bf16.mxu1 %v1036_v18  ;;  %v1040_v31 = vpack.c.bf16 %v438_v29, %v436_v28  ;;  %v421_v32 = vld [vmem:[%s1647_s29 + $0x50] sm:$0xff]  ;;  %v435_v33 = vld [vmem:[%s1654_s13 + $0x40] sm:$0xff]  ;;  %v424_v36 = vld [vmem:[%s1647_s29 + $0x68] sm:$0xff]  ;;  %v1408_v53 = vmov 1966171168   ;;  %s734_s14 = sshll.u32 %s1717_s21, 4  ;;  %s1760_s18 = scalar_lea.hbm %s1918_s4, %s1733_s15  ;;  %s1752_s14 = int_to_ptr.vmem [resolvable:$true] %s734_s14 }
  0x7e   : > { %v437_v34 = vld [vmem:[%s1654_s13 + $0x50] sm:$0xff]  ;;  %1023 = vmatpush1.bf16.msra.mxu0 %v1022_v22  ;;  %v1026_v35 = vpack.c.bf16 %v421_v32, %v419_v30  ;;  %v426_v37 = vld [vmem:[%s1647_s29 + $0x78] sm:$0xff]  ;;  %v440_v38 = vld [vmem:[%s1654_s13 + $0x68] sm:$0xff]  ;;  %v603_v54 = vunpack.c.l.s4 %v1408_v53  ;;  %s748_s10 = sshll.u32 %s1705_s8, 4  ;;  %s691_s1 = scalar_lea.sflag [#allocation4], %s1643_s26  ;;  %s1776_s10 = int_to_ptr.vmem [resolvable:$true] %s748_s10 }
  0x7f   : > { %1039 = vmatpush1.bf16.msra.mxu1 %v1038_v26  ;;  %1025 = vmatprep.subr.bf16.mxu0 %v1024_v27  ;;  %v1042_v39 = vpack.c.bf16 %v437_v34, %v435_v33  ;;  %v1028_v40 = vpack.c.bf16 %v426_v37, %v424_v36  ;;  %v442_v41 = vld [vmem:[%s1654_s13 + $0x78] sm:$0xff]  ;;  %v423_v42 = vld [vmem:[%s1647_s29 + $0x60] sm:$0xff]  ;;  %v425_v43 = vld [vmem:[%s1647_s29 + $0x70] sm:$0xff]  ;;  %v445_v55 = vstv %s444_s20  ;;  %s720_s29 = sshll.u32 %s1711_s22, 4  ;;  %p1951_p12 = scmp.ne.s32.totalorder %s1935_s11, 0  ;;  %s1762_s29 = int_to_ptr.vmem [resolvable:$true] %s720_s29 }
  0x80   : > { %1041 = vmatprep.subr.bf16.mxu1 %v1040_v31  ;;  %v1044_v44 = vpack.c.bf16 %v442_v41, %v440_v38  ;;  %v439_v45 = vld [vmem:[%s1654_s13 + $0x60] sm:$0xff]  ;;  %v441_v46 = vld [vmem:[%s1654_s13 + $0x70] sm:$0xff]  ;;  %v1030_v47 = vpack.c.bf16 %v425_v43, %v423_v42  ;;  %v443_v49 = vld [vmem:[%s1917_s3] sm:$0x1]  ;;  %v604_v56 = vunpack.c.0.s8 %v603_v54  ;;  %v523_v58 = vstv %s994_s17  ;;  %s1747_s13 = scalar_lea.hbm %s1919_s5, %s1733_s15  ;;  %s1770_s17 = scalar_lea.hbm %s1920_s6, %s1733_s15 }
  0x81   : > { %v1046_v48 = vpack.c.bf16 %v441_v46, %v439_v45  ;;  %v521_v50 = vld [vmem:[%s1917_s3 + $0x1] sm:$0x1]  ;;  %v598_v14 = vld [vmem:[%s1711_s22] sm:$0x3]  ;;  %v646_v17 = vld [vmem:[%s1705_s8] sm:$0x3] }
  0x82   : > { %1027 = vmatpush1.bf16.msra.mxu0 %v1026_v35  ;;  %v1729_v1 = vsub.s32 %v604_v56, %v606_v57  ;;  %v623_v20 = vld [vmem:[%s1717_s21] sm:$0x3]  ;;  %s1218_s23 = scalar_lea.vmem %s1762_s29, 32  ;;  %s1409_s16 = smov [#allocation9]  }
  0x83   : > { %1043 = vmatpush1.bf16.msra.mxu1 %v1042_v39  ;;  %1029 = vmatprep.subr.bf16.mxu0 %v1028_v40  ;;  %v667_v23 = vld [vmem:[%s1723_s9] sm:$0x3]  ;;  %p1219_p13 = scmp.ne.s32.totalorder %s1762_s29, %s1218_s23  ;;  %s1222_s19 = sshll.u32 %s1409_s16, 4  ;;  %s1223_s19 = int_to_ptr.vmem [resolvable:$false] %s1222_s19 }
  0x84   : > { %1045 = vmatprep.subr.bf16.mxu1 %v1044_v44  ;;  %s1224_s20 = scalar_lea.vmem %s1223_s19, 64  ;;  %p1225_p11 = scmp.lt.s32.totalorder %s1762_s29, %s1223_s19 }
  0x85   : > { %p1220_p2 = pnand %p1219_p13, %p1951_p12  ;;  %p1226_p5 = scmp.lt.s32.totalorder %s1224_s20, %s1218_s23 }
  0x86   : > { %1031 = vmatpush1.bf16.msra.mxu0 %v1030_v47 }
  0x87   : > { %1047 = vmatpush1.bf16.msra.mxu1 %v1046_v48  ;;  %p1221_p10 = pneg %p1220_p2  ;;  %p1227_p3 = por %p1226_p5, %p1225_p11 }
  0x89   : > { %993 = vmatmul.mubr.msk.f32.vlgmr.msra.gmra.mrb[0].mxu0 %vm446_vm0, %v443_v49  ;;  %p1228_p7 = pnand %p1227_p3, %p1221_p10 }
  0x8a   : > { %995 = vmatmul.mubr.msk.f32.vlgmr.msra.gmra.mrb[0].mxu1 %vm446_vm0, %v521_v50 }
 0x15c   : > { %v516_v59 = vpop.f32.mrb[0].mxu0 }
 0x15d   : > { %v517_v60 = vadd.f32 %v516_v59, %v445_v55  ;;  %v593_v61 = vpop.f32.mrb[0].mxu1  ;;  %v518_v62 = vpop.f32.mrb[1].mxu0 }
 0x15e   : > { %v594_v63 = vadd.f32 %v593_v61, %v523_v58  ;;  %v519_v0 = vadd.f32 %v518_v62, %v445_v55  ;;  %v595_v2 = vpop.f32.mrb[1].mxu1 }
 0x15f   : > { %v624_v3 = vmul.f32 %v517_v60, %v517_v60  ;;  %v596_v4 = vadd.f32 %v595_v2, %v523_v58 }
 0x160   : > { %v668_v5 = vmul.f32 %v594_v63, %v594_v63  ;;  %v601_v6 = vcombine.low %v517_v60, %v519_v0  ;;  %v625_v7 = vmul.f32 %v519_v0, %v519_v0 }
 0x161   : > { %v649_v8 = vcombine.low %v594_v63, %v596_v4  ;;  %v669_v9 = vmul.f32 %v596_v4, %v596_v4 }
 0x162   : > { %v608_v10 = vrot.slane %v601_v6, %v1729_v1  ;;  %v628_v11 = vcombine.low %v624_v3, %v625_v7 }
 0x163   : > { %v656_v12 = vrot.slane %v649_v8, %v1729_v1  ;;  %v672_v13 = vcombine.low %v668_v5, %v669_v9 }
 0x164   : > { %v615_v15 = vrot.slane %v608_v10, %v1729_v1  ;;  %v635_v16 = vrot.slane %v628_v11, %v1729_v1 }
 0x165   : > { %v663_v18 = vrot.slane %v656_v12, %v1729_v1  ;;  %v679_v19 = vrot.slane %v672_v13, %v1729_v1 }
 0x166   : > { %v642_v21 = vrot.slane %v635_v16, %v1729_v1  ;;  %v617_v22 = vadd.f32 %v615_v15, %v598_v14 }
 0x167   : > { %v665_v24 = vadd.f32 %v663_v18, %v646_v17  ;;  %v686_v25 = vrot.slane %v679_v19, %v1729_v1 }
 0x168   : > { %v644_v26 = vadd.f32 %v642_v21, %v623_v20  ;;  %622 = vst.msk [vmem:[%s1711_s22] sm:$0x3] %vm1701_vm1, %v617_v22 }
 0x169   : > { %666 = vst.msk [vmem:[%s1705_s8] sm:$0x3] %vm1701_vm1, %v665_v24 }
 0x16a   : > { %1231 = shalt.err (!%p1228_p7)
}
 0x16b   : > { %s1232_s8 = scalar_lea.hbm %s1760_s18, 32  ;;  %s1236_s16 = scalar_lea.hbm %s1918_s4, 64 }
 0x16c   : > { %p1233_p6 = scmp.ne.s32.totalorder %s1760_s18, %s1232_s8  ;;  %p1237_p0 = scmp.lt.u32.totalorder %s1760_s18, %s1918_s4 }
 0x16d   : > { %p1238_p8 = scmp.lt.u32.totalorder %s1236_s16, %s1232_s8  ;;  %p1240_p13 = scmp.lt.u32.totalorder %s1232_s8, %s1760_s18 }
 0x16e   : > { %p1234_p1 = pnand %p1233_p6, %p1951_p12 }
 0x16f   : > { %p1239_p4 = por %p1238_p8, %p1237_p0 }
 0x170   : > { %p1235_p9 = pneg %p1234_p1 }
 0x171   : > { %p1241_p2 = por %p1240_p13, %p1239_p4 }
 0x173   : > { %p1242_p10 = pnand %p1241_p2, %p1235_p9 }
 0x175   : > { %1245 = shalt.err (!%p1242_p10)
}
 0x176   : > { %1056 = dma.vmem_to_hbm [thread:$0]  (%p1951_p12), %s1762_s29, 32, %s1760_s18, %s691_s1   ;;  %v688_v27 = vadd.f32 %v686_v25, %v667_v23  ;;  %645 = vst.msk [vmem:[%s1717_s21] sm:$0x3] %vm1701_vm1, %v644_v26 }
 0x177   : > { %s1810_s23 = scalar_lea.hbm %s1921_s7, %s1733_s15  ;;  %s1952_s20 = sshll.u32 %s1723_s9, 4  ;;  %s1814_s20 = int_to_ptr.vmem [resolvable:$true] %s1952_s20 }
 0x178   : > { %s1953_s8 = sand.u32 1, %s1484_s30   ;;  %s1246_s16 = scalar_lea.vmem %s1752_s14, 32 }
 0x179   : > { %s1818_s22 = scalar_lea.sflag [#allocation11], %s1953_s8  ;;  %p1247_p11 = scmp.ne.s32.totalorder %s1752_s14, %s1246_s16 }
 0x17a   : > { %s1410_s29 = smov [#allocation10]  }
 0x17b   : > { %p1248_p5 = pnand %p1247_p11, %p1951_p12  ;;  %s1250_s18 = sshll.u32 %s1410_s29, 4  ;;  %s1251_s18 = int_to_ptr.vmem [resolvable:$false] %s1250_s18 }
 0x17c   : > { %s1252_s21 = scalar_lea.vmem %s1251_s18, 64  ;;  %p1253_p7 = scmp.lt.s32.totalorder %s1752_s14, %s1251_s18 }
 0x17d   : > { %p1249_p3 = pneg %p1248_p5  ;;  %p1254_p6 = scmp.lt.s32.totalorder %s1252_s21, %s1246_s16 }
 0x17f   : > { %p1255_p1 = por %p1254_p6, %p1253_p7 }
 0x181   : > { %p1256_p9 = pnand %p1255_p1, %p1249_p3 }
 0x183   : > { %1259 = shalt.err (!%p1256_p9)
}
 0x184   : > { %s1260_s30 = scalar_lea.hbm %s1747_s13, 32  ;;  %s1264_s19 = scalar_lea.hbm %s1919_s5, 64 }
 0x185   : > { %p1261_p0 = scmp.ne.s32.totalorder %s1747_s13, %s1260_s30  ;;  %p1265_p13 = scmp.lt.u32.totalorder %s1747_s13, %s1919_s5 }
 0x186   : > { %p1266_p2 = scmp.lt.u32.totalorder %s1264_s19, %s1260_s30  ;;  %p1268_p11 = scmp.lt.u32.totalorder %s1260_s30, %s1747_s13 }
 0x187   : > { %p1262_p8 = pnand %p1261_p0, %p1951_p12 }
 0x188   : > { %p1267_p10 = por %p1266_p2, %p1265_p13 }
 0x189   : > { %p1263_p4 = pneg %p1262_p8 }
 0x18a   : > { %p1269_p5 = por %p1268_p11, %p1267_p10 }
 0x18c   : > { %p1270_p3 = pnand %p1269_p5, %p1263_p4 }
 0x18e   : > { %1273 = shalt.err (!%p1270_p3)
}
 0x18f   : > { %1057 = dma.vmem_to_hbm [thread:$0]  (%p1951_p12), %s1752_s14, 32, %s1747_s13, %s1818_s22   ;;  %689 = vst.msk [vmem:[%s1723_s9] sm:$0x3] %vm1701_vm1, %v688_v27 }
 0x190   : > { %s1274_s8 = scalar_lea.vmem %s1776_s10, 32  ;;  %s1411_s16 = smov [#allocation12]  }
 0x191   : > { %p1275_p7 = scmp.ne.s32.totalorder %s1776_s10, %s1274_s8  ;;  %s1278_s29 = sshll.u32 %s1411_s16, 4  ;;  %s1279_s29 = int_to_ptr.vmem [resolvable:$false] %s1278_s29 }
 0x192   : > { %s1280_s18 = scalar_lea.vmem %s1279_s29, 64  ;;  %p1281_p9 = scmp.lt.s32.totalorder %s1776_s10, %s1279_s29 }
 0x193   : > { %p1276_p6 = pnand %p1275_p7, %p1951_p12  ;;  %p1282_p0 = scmp.lt.s32.totalorder %s1280_s18, %s1274_s8 }
 0x195   : > { %p1277_p1 = pneg %p1276_p6  ;;  %p1283_p8 = por %p1282_p0, %p1281_p9 }
 0x197   : > { %p1284_p4 = pnand %p1283_p8, %p1277_p1 }
 0x199   : > { %1287 = shalt.err (!%p1284_p4)
}
 0x19a   : > { %s1288_s9 = scalar_lea.hbm %s1770_s17, 32  ;;  %s1292_s21 = scalar_lea.hbm %s1920_s6, 64 }
 0x19b   : > { %p1289_p13 = scmp.ne.s32.totalorder %s1770_s17, %s1288_s9  ;;  %p1293_p11 = scmp.lt.u32.totalorder %s1770_s17, %s1920_s6 }
 0x19c   : > { %p1294_p5 = scmp.lt.u32.totalorder %s1292_s21, %s1288_s9  ;;  %p1296_p7 = scmp.lt.u32.totalorder %s1288_s9, %s1770_s17 }
 0x19d   : > { %p1290_p2 = pnand %p1289_p13, %p1951_p12 }
 0x19e   : > { %p1295_p3 = por %p1294_p5, %p1293_p11 }
 0x19f   : > { %p1291_p10 = pneg %p1290_p2 }
 0x1a0   : > { %p1297_p6 = por %p1296_p7, %p1295_p3 }
 0x1a2   : > { %p1298_p1 = pnand %p1297_p6, %p1291_p10 }
 0x1a4   : > { %1301 = shalt.err (!%p1298_p1)
}
 0x1a5   : > { %1058 = dma.vmem_to_hbm [thread:$0]  (%p1951_p12), %s1776_s10, 32, %s1770_s17, %s1818_s22  }
 0x1a6   : > { %s706_s1 = scalar_lea.sflag [#allocation14], %s1643_s26  ;;  %s1302_s19 = scalar_lea.vmem %s1814_s20, 32 }
 0x1a7   : > { %p1303_p9 = scmp.ne.s32.totalorder %s1814_s20, %s1302_s19  ;;  %s1412_s0 = smov [#allocation13]  }
 0x1a8   : > { %s1306_s27 = sshll.u32 %s1412_s0, 4  ;;  %s1307_s27 = int_to_ptr.vmem [resolvable:$false] %s1306_s27 }
 0x1a9   : > { %p1304_p0 = pnand %p1303_p9, %p1951_p12  ;;  %s1308_s8 = scalar_lea.vmem %s1307_s27, 64 }
 0x1aa   : > { %p1309_p4 = scmp.lt.s32.totalorder %s1814_s20, %s1307_s27  ;;  %p1310_p13 = scmp.lt.s32.totalorder %s1308_s8, %s1302_s19 }
 0x1ab   : > { %p1305_p8 = pneg %p1304_p0 }
 0x1ac   : > { %p1311_p2 = por %p1310_p13, %p1309_p4 }
 0x1ae   : > { %p1312_p10 = pnand %p1311_p2, %p1305_p8 }
 0x1b0   : > { %1315 = shalt.err (!%p1312_p10)
}
 0x1b1   : > { %s1316_s26 = scalar_lea.hbm %s1810_s23, 32  ;;  %s1320_s22 = scalar_lea.hbm %s1921_s7, 64 }
 0x1b2   : > { %p1317_p11 = scmp.ne.s32.totalorder %s1810_s23, %s1316_s26  ;;  %p1321_p7 = scmp.lt.u32.totalorder %s1810_s23, %s1921_s7 }
 0x1b3   : > { %p1322_p6 = scmp.lt.u32.totalorder %s1320_s22, %s1316_s26  ;;  %p1324_p9 = scmp.lt.u32.totalorder %s1316_s26, %s1810_s23 }
 0x1b4   : > { %p1318_p5 = pnand %p1317_p11, %p1951_p12 }
 0x1b5   : > { %p1323_p1 = por %p1322_p6, %p1321_p7 }
 0x1b6   : > { %p1319_p3 = pneg %p1318_p5 }
 0x1b7   : > { %p1325_p0 = por %p1324_p9, %p1323_p1 }
 0x1b9   : > { %p1326_p8 = pnand %p1325_p0, %p1319_p3 }
 0x1bb   : > { %1329 = shalt.err (!%p1326_p8)
}
 0x1bc   : > { %1059 = dma.vmem_to_hbm [thread:$0]  (%p1951_p12), %s1814_s20, 32, %s1810_s23, %s706_s1  }
 0x1bd PF: > { %s1954_s18 = sld [smem:[#allocation22_spill]]  ;;  %s774_s9 = sand.u32 1, %s1380_s24  }
 0x1be   : > { %p1955_p4 = scmp.ne.s32.totalorder %s1936_s12, 0  ;;  %s775_s14 = scalar_lea.sflag [#allocation4], %s774_s9 }
 0x1c3   : > { %p1956_p13 = scmp.ge.s32.totalorder %s1954_s18, 2 }
 0x1c5   : > { %p1076_p2 = pnand %p1956_p13, %p1955_p4 }
 0x1c7   : > { %1367 = dma.done.wait (!%p1076_p2), %s775_s14, 32  }
 0x1c8   : > { %1369 = vsyncadd (!%p1076_p2), %s775_s14, 4294967264  ;;  %s1957_s13 = sadd.s32 4294967294, %s1954_s18  }
 0x1c9   : > { %s783_s21 = sand.u32 1, %s1957_s13  }
 0x1ca   : > { %s784_s30 = scalar_lea.sflag [#allocation11], %s783_s21 }
 0x1cb   : > { %1371 = dma.done.wait (!%p1076_p2), %s784_s30, 64  }
 0x1cc   : > { %1373 = vsyncadd (!%p1076_p2), %s784_s30, 4294967232  ;;  %s802_s11 = scalar_lea.sflag [#allocation14], %s774_s9 }
 0x1cd   : > { %1375 = dma.done.wait (!%p1076_p2), %s802_s11, 32  }
 0x1ce   : > { %1377 = vsyncadd (!%p1076_p2), %s802_s11, 4294967264  ;;  %s34_s29 = sadd.s32 1, %s1954_s18   ;;  %s1958_s23 = sld [smem:[#allocation21_spill]] }
 0x1cf   : > { %p31_p12 = scmp.ge.s32.totalorder %s34_s29, 4   ;;  %s1959_s26 = sld [smem:[#allocation24_spill]] }
 0x1d0   : > { %s1960_s12 = sld [smem:[#allocation23_spill]]  ;;  %s1961_s24 = smov %s1384_s25 }
 0x1d1   : > { %s1963_s27 = smov %s1396_s28  ;;  %33 = sbr.rel (!%p31_p12) target bundleno = 16 (0x10), region = 152 }
 0x1d4   : > { %s1962_s25 = smov %s1958_s23 }
 0x1d6   : > { %s1964_s28 = smov %s1960_s12 }
 0x1d8   :  { %807 = vsyncpa [#allocation3], 1 }
 0x1d9   :  { %809 = vsyncpa [#allocation3 + $0x1], 1 }
 0x1da   :  { %810 = vsyncpa [#allocation8], 1 }
 0x1db   :  { %812 = vsyncpa [#allocation8 + $0x1], 1 }
 0x1dc   :  { %813 = vsyncpa [#allocation4], 1 }
 0x1dd   :  { %815 = vsyncpa [#allocation4 + $0x1], 1 }
 0x1de   :  { %816 = vsyncpa [#allocation11], 1 }
 0x1df   :  { %818 = vsyncpa [#allocation11 + $0x1], 1 }
 0x1e0   :  { %819 = vsyncpa [#allocation14], 1 }
 0x1e1   :  { %821 = vsyncpa [#allocation14 + $0x1], 1 }
 0x1e2   :  { %822 = vsyncpa [#allocation5], 1 }
 0x1e3   :  { %824 = vsyncpa [#allocation5 + $0x1], 1 }

</bundles_post_ra>
